<compile_context>
chip_gen: v5e
topology: v5e:2x2
jax: 0.10.0
libtpu: 0.0.40
codegen_flags: <defaults>
</compile_context>

<pallas_src>
import jax
import jax.numpy as jnp
from jax.experimental import pallas as pl
from jax.experimental.pallas import tpu as pltpu


def _add_one_kernel(x_ref, o_ref):
    # Pure scalar path: single sld + sadd + sst in SMEM.
    o_ref[0] = x_ref[0] + jnp.float32(1.0)


def add_one(x_scalar: jax.Array) -> jax.Array:
    """Compute x + 1 via a Pallas TPU kernel. Accepts a scalar (0-d) array."""
    x1 = jnp.asarray(x_scalar, dtype=jnp.float32).reshape(1)
    out = pl.pallas_call(
        _add_one_kernel,
        out_shape=jax.ShapeDtypeStruct((1,), jnp.float32),
        in_specs=[pl.BlockSpec(memory_space=pltpu.MemorySpace.SMEM)],
        out_specs=pl.BlockSpec(memory_space=pltpu.MemorySpace.SMEM),
    )(x1)
    return out.reshape(())  # back to 0-d scalar, matching torch semantics


if __name__ == "__main__":
    # The module has no parameters; the reference script feeds torch.tensor(1.0).
    key = jax.random.PRNGKey(0)  # unused (scalar input), kept for convention
    x = jnp.float32(1.0)

    y = add_one(x)
    jax.block_until_ready(y)

    expected = jnp.float32(2.0)
    assert y.shape == ()
    assert jnp.allclose(y, expected), (y, expected)
    print("KERNEL_OK")
</pallas_src>

<mosaic_0001>
module attributes {stable_mosaic.version = 11 : i64} {
  func.func @_add_one_kernel(%arg0: memref<1xf32, #tpu.memory_space<smem>>, %arg1: memref<1xf32, #tpu.memory_space<smem>>) attributes {dimension_semantics = [], scalar_prefetch = 0 : i64, scratch_operands = 0 : i64, tpu.core_type = #tpu.core_type<tc>} {
    %c0 = arith.constant 0 : index
    %0 = memref.load %arg0[%c0] : memref<1xf32, #tpu.memory_space<smem>>
    %cst = arith.constant 1.000000e+00 : f32
    %1 = arith.addf %0, %cst : f32
    %c0_0 = arith.constant 0 : index
    %2 = memref.load %arg1[%c0_0] : memref<1xf32, #tpu.memory_space<smem>>
    memref.store %1, %arg1[%c0_0] : memref<1xf32, #tpu.memory_space<smem>>
    return
  }
}

</mosaic_0001>

<bundles_post_ra>
// kernel: tpu_custom_call.1
= control target key start
LH: loop header
LB: loop body
LE: loop exit
PB: predicated region body
PF: predicated region fallthrough
CT: control target
= control target key end

     0   :  { %7 = vsyncpa [#allocation4], 0  ;;  %s44_s12 = smov [#allocation3]   ;;  %s61_s0 = inlined_call_operand.<no memory space> [shape: f32[1], index: 0, kind: input, shape index: {}]   ;;  %s62_s1 = inlined_call_operand.hbm [shape: f32[1], index: 1, kind: output, shape index: {}]  }
   0x1   :  { %s11_s8 = sadd.f32 1.0, %s61_s0  ;;  %s19_s11 = sshll.u32 %s62_s1, 4  ;;  %s20_s11 = int_to_ptr.hbm [resolvable:$true] %s19_s11 }
   0x3   :  { %13 = sst [smem:[#allocation3]] %s11_s8 }
   0x4   :  { %22 = dma.smem_to_hbm %s44_s12, 16, %s20_s11, [#allocation4]  }
   0x5   :  { %42 = dma.done.wait [#allocation4], 16  }
   0x6   :  { %43 = vsyncadd [#allocation4], 4294967280 }
   0x7   :  { %27 = sfence }
   0x8   :  { %28 = vsyncpa [#allocation4], 1 }

</bundles_post_ra>
